<compile_context>
chip_gen: v5e
topology: v5e:2x2
jax: 0.10.0
libtpu: 0.0.40
codegen_flags: <defaults>
</compile_context>

<pallas_src>
import functools

import jax
import jax.numpy as jnp
from jax.experimental import pallas as pl
from jax.experimental.pallas import tpu as pltpu


# 48 MiB: above the 32 MiB scoped default (helps v5e/v6e tiling) and below v7x's
# 64 MiB physical VMEM.  Tune per generation (v5e/v6e tolerate 64-96 MiB).
_VMEM_LIMIT = 48 * 1024 * 1024


def _tile(n, target):
    """Largest multiple-of-8 divisor of n that is <= target; falls back to n.

    The fallback is bounded: tiles here are per-(projection/batch/head), so a full
    tile is at most (seq, d_model), never (batch*seq, d_model)."""
    if n <= target:
        return n
    t = target - (target % 8)
    while t >= 8:
        if n % t == 0:
            return t
        t -= 8
    return n


# ---------------------------------------------------------------------------
# Fused QKV projection: one kernel, grid=(3, batch, seq_tiles), head-split output.
# ---------------------------------------------------------------------------

def _qkv_proj_kernel(x_ref, w_ref, b_ref, o_ref, *, n_head, d_head):
    # x: (1,1,ts,d_model) bf16 ; w: (1,d_model,d_model) bf16 ; b: (1,1,d_model) f32
    # o: (1,1,n_head,ts,d_head) bf16  (head-major layout -> no XLA transpose later)
    x = x_ref[0, 0]
    w = w_ref[0]
    y = jnp.dot(x, w, preferred_element_type=jnp.float32) + b_ref[0]
    y = y.astype(o_ref.dtype)
    # In-VMEM head split (static lane slices); each store is a full (ts, d_head)
    # block slab (no misaligned masked stores).
    for h in range(n_head):
        o_ref[0, 0, h] = y[:, h * d_head:(h + 1) * d_head]


def pallas_qkv_projection(x, w, b, n_head, *, seq_tile_target=512):
    """x: (3, B, S, d_model) bf16; w: (3, d_model, d_model) bf16; b: (3, 1, d_model) f32.
    Returns qkv: (3, B, n_head, S, d_head) bf16."""
    g, batch, seq, d_model = x.shape
    d_head = d_model // n_head
    ts = _tile(seq, seq_tile_target)
    kernel = functools.partial(_qkv_proj_kernel, n_head=n_head, d_head=d_head)
    return pl.pallas_call(
        kernel,
        out_shape=jax.ShapeDtypeStruct((g, batch, n_head, seq, d_head), jnp.bfloat16),
        grid=(g, batch, seq // ts),
        in_specs=[
            pl.BlockSpec((1, 1, ts, d_model), lambda p, bi, i: (p, bi, i, 0)),
            pl.BlockSpec((1, d_model, d_model), lambda p, bi, i: (p, 0, 0)),
            pl.BlockSpec((1, 1, d_model), lambda p, bi, i: (p, 0, 0)),
        ],
        out_specs=pl.BlockSpec((1, 1, n_head, ts, d_head),
                               lambda p, bi, i: (p, bi, 0, i, 0)),
        compiler_params=pltpu.CompilerParams(
            dimension_semantics=("parallel", "parallel", "parallel"),
            vmem_limit_bytes=_VMEM_LIMIT,
        ),
    )(x, w, b)


# ---------------------------------------------------------------------------
# Attention: grid=(batch, head, q_tile), purely 2-D math per step.
# ---------------------------------------------------------------------------

def _attention_kernel(q_ref, k_ref, v_ref, mask_ref, ctx_ref, soft_ref):
    q = q_ref[0, 0, 0]      # (tq, Dh) bf16 -- 1/d_head**2 scale already folded into W_q/b_q
    k = k_ref[0, 0, 0]      # (S,  Dh) bf16
    v = v_ref[0, 0, 0]      # (S,  Dh) bf16
    mask = mask_ref[0]      # (tq, S) int8, nonzero == masked out (shared across heads)

    # q @ k^T as an NT matmul straight on the MXU (no k transpose materialized).
    scores = jax.lax.dot_general(
        q, k, (((1,), (1,)), ((), ())),
        preferred_element_type=jnp.float32)                     # (tq, S) f32

    # masked_fill_(attn_mask, -1e9)
    scores = jnp.where(mask != 0, jnp.float32(-1.0e9), scores)

    # Numerically-stable softmax; reciprocal on the EUP (separate VLIW slot).
    m = jnp.max(scores, axis=-1, keepdims=True)
    e = jnp.exp(scores - m)
    denom = jnp.sum(e, axis=-1, keepdims=True)
    soft = (e * pl.reciprocal(denom, approx=True)).astype(jnp.bfloat16)

    soft_ref[0, 0] = soft                                       # bf16 writeback (2x less HBM)
    ctx = jnp.dot(soft, v, preferred_element_type=jnp.float32)  # (tq, Dh) f32
    ctx_ref[0, 0] = ctx.astype(ctx_ref.dtype)


def pallas_self_dot_attention(qkv, mask, *, q_tile_target=256):
    """qkv: (3, B, H, S, Dh) bf16 (q/k/v stacked); mask: (B, S, S) int8.
    Returns ctx: (B, H, S, Dh) bf16, soft: (B, H, S, S) bf16."""
    _, batch, n_head, seq, d_head = qkv.shape
    tq = _tile(seq, q_tile_target)
    ctx, soft = pl.pallas_call(
        _attention_kernel,
        out_shape=(
            jax.ShapeDtypeStruct((batch, n_head, seq, d_head), jnp.bfloat16),
            jax.ShapeDtypeStruct((batch, n_head, seq, seq), jnp.bfloat16),
        ),
        grid=(batch, n_head, seq // tq),
        in_specs=[
            # Same stacked tensor passed three times -> no XLA slice copies in HBM.
            pl.BlockSpec((1, 1, 1, tq, d_head), lambda b, h, i: (0, b, h, i, 0)),
            pl.BlockSpec((1, 1, 1, seq, d_head), lambda b, h, i: (1, b, h, 0, 0)),
            pl.BlockSpec((1, 1, 1, seq, d_head), lambda b, h, i: (2, b, h, 0, 0)),
            pl.BlockSpec((1, tq, seq), lambda b, h, i: (b, i, 0)),
        ],
        out_specs=(
            pl.BlockSpec((1, 1, tq, d_head), lambda b, h, i: (b, h, i, 0)),
            pl.BlockSpec((1, 1, tq, seq), lambda b, h, i: (b, h, i, 0)),
        ),
        compiler_params=pltpu.CompilerParams(
            dimension_semantics=("parallel", "parallel", "parallel"),
            vmem_limit_bytes=_VMEM_LIMIT,
        ),
    )(qkv, qkv, qkv, mask)
    return ctx, soft


# ---------------------------------------------------------------------------
# Output projection with the head-concat folded in: grid reduction over heads.
# ---------------------------------------------------------------------------

def _out_proj_kernel(ctx_ref, w_ref, b_ref, o_ref, acc_ref):
    h = pl.program_id(2)

    @pl.when(h == 0)
    def _():
        acc_ref[...] = jnp.zeros_like(acc_ref)

    # (tq, Dh) @ (Dh, d_model), accumulated in f32 across the head axis.
    acc_ref[...] += jnp.dot(ctx_ref[0, 0], w_ref[0],
                            preferred_element_type=jnp.float32)

    @pl.when(h == pl.num_programs(2) - 1)
    def _():
        o_ref[0] = (acc_ref[...] + b_ref[...]).astype(o_ref.dtype)


def pallas_output_projection(ctx, w_o, b_o, *, q_tile_target=512):
    """ctx: (B, H, S, Dh) bf16; w_o: (d_model, d_model); b_o: (d_model,).
    Returns out: (B, S, d_model) f32 (heads reduced inside the kernel; no concat)."""
    batch, n_head, seq, d_head = ctx.shape
    d_model = n_head * d_head
    tq = _tile(seq, q_tile_target)
    w = w_o.reshape(n_head, d_head, d_model).astype(jnp.bfloat16)
    b = b_o.reshape(1, d_model).astype(jnp.float32)
    return pl.pallas_call(
        _out_proj_kernel,
        out_shape=jax.ShapeDtypeStruct((batch, seq, d_model), jnp.float32),
        grid=(batch, seq // tq, n_head),           # head reduction axis last
        in_specs=[
            pl.BlockSpec((1, 1, tq, d_head), lambda bi, i, h: (bi, h, i, 0)),
            pl.BlockSpec((1, d_head, d_model), lambda bi, i, h: (h, 0, 0)),
            pl.BlockSpec((1, d_model), lambda bi, i, h: (0, 0)),
        ],
        out_specs=pl.BlockSpec((1, tq, d_model), lambda bi, i, h: (bi, i, 0)),
        scratch_shapes=[pltpu.VMEM((tq, d_model), jnp.float32)],
        compiler_params=pltpu.CompilerParams(
            dimension_semantics=("parallel", "parallel", "arbitrary"),
            vmem_limit_bytes=_VMEM_LIMIT,
        ),
    )(ctx, w, b)


# ---------------------------------------------------------------------------
# Multi-head attention forward (glue in plain JAX, hot paths in Pallas)
# ---------------------------------------------------------------------------

def multi_head_attention_forward(Q, K, V, attn_mask, params, n_head):
    """
    Q, K, V:   (batch, seq, d_model) float32
    attn_mask: (batch, 1, seq, seq) or (batch, seq, seq), nonzero/True = masked out
    params:    dict with W_q/b_q, W_k/b_k, W_v/b_v, W_o/b_o
    Returns (output (batch, seq, d_model) f32, soft_mat (batch, n_head, seq, seq) bf16)
    """
    batch, seq, d_model = Q.shape
    d_head = d_model // n_head

    # NOTE: the PyTorch module divides by K.size(-1) ** 2 (d_head SQUARED), not sqrt.
    # Fold the scale into W_q / b_q in f32 (exactly equivalent, removes the in-kernel
    # elementwise multiply, avoids any bf16 small-value scaling in the kernel).
    scale = 1.0 / float(d_head * d_head)

    # bf16 activations stacked once (half the HBM traffic of an f32 stack).
    x_stack = jnp.stack([Q.astype(jnp.bfloat16),
                         K.astype(jnp.bfloat16),
                         V.astype(jnp.bfloat16)])                      # (3, B, S, d_model)
    w_stack = jnp.stack([params["W_q"] * scale, params["W_k"], params["W_v"]]
                        ).astype(jnp.bfloat16)                         # (3, d_model, d_model)
    b_stack = jnp.stack([params["b_q"] * scale, params["b_k"], params["b_v"]]
                        ).reshape(3, 1, d_model).astype(jnp.float32)

    # Fused Q/K/V projection, output already head-split: (3, B, H, S, Dh) bf16.
    qkv = pallas_qkv_projection(x_stack, w_stack, b_stack, n_head)

    # Mask shared across heads: (B, S, S) int8 (no per-head broadcast materialized).
    mask3 = attn_mask[:, 0] if attn_mask.ndim == 4 else attn_mask
    mask3 = mask3.astype(jnp.int8)

    ctx, soft = pallas_self_dot_attention(qkv, mask3)   # ctx (B,H,S,Dh), soft (B,H,S,S) bf16

    # Output projection with the head-concat folded in as a grid reduction over H.
    out = pallas_output_projection(ctx, params["W_o"], params["b_o"])  # (B, S, d_model) f32

    return out, soft


# ---------------------------------------------------------------------------
# Pure-JAX f32 reference (for correctness check)
# ---------------------------------------------------------------------------

def reference_forward(Q, K, V, attn_mask, params, n_head):
    batch, seq, d_model = Q.shape
    d_head = d_model // n_head

    def lin(x, w, b):
        return x @ w + b

    def split_heads(x):
        return x.reshape(batch, seq, n_head, d_head).transpose(0, 2, 1, 3)

    q_h = split_heads(lin(Q, params["W_q"], params["b_q"]))
    k_h = split_heads(lin(K, params["W_k"], params["b_k"]))
    v_h = split_heads(lin(V, params["W_v"], params["b_v"]))

    scores = jnp.einsum("bhqd,bhkd->bhqk", q_h, k_h) / float(d_head) ** 2
    scores = jnp.where(attn_mask, -1.0e9, scores)
    soft = jax.nn.softmax(scores, axis=-1)
    ctx = jnp.einsum("bhqk,bhkd->bhqd", soft, v_h)
    ctx = ctx.transpose(0, 2, 1, 3).reshape(batch, seq, d_model)
    out = ctx @ params["W_o"] + params["b_o"]
    return out, soft


# ---------------------------------------------------------------------------
# Main
# ---------------------------------------------------------------------------

if __name__ == "__main__":
    batch, seq, d_model, n_head = 2, 8, 32, 4

    key = jax.random.PRNGKey(0)
    keys = jax.random.split(key, 12)

    Q = jax.random.normal(keys[0], (batch, seq, d_model), dtype=jnp.float32)
    K = jax.random.normal(keys[1], (batch, seq, d_model), dtype=jnp.float32)
    V = jax.random.normal(keys[2], (batch, seq, d_model), dtype=jnp.float32)

    scale = 0.1
    params = {
        "W_q": scale * jax.random.normal(keys[3], (d_model, d_model), jnp.float32),
        "b_q": scale * jax.random.normal(keys[4], (d_model,), jnp.float32),
        "W_k": scale * jax.random.normal(keys[5], (d_model, d_model), jnp.float32),
        "b_k": scale * jax.random.normal(keys[6], (d_model,), jnp.float32),
        "W_v": scale * jax.random.normal(keys[7], (d_model, d_model), jnp.float32),
        "b_v": scale * jax.random.normal(keys[8], (d_model,), jnp.float32),
        "W_o": scale * jax.random.normal(keys[9], (d_model, d_model), jnp.float32),
        "b_o": scale * jax.random.normal(keys[10], (d_model,), jnp.float32),
    }

    # Causal-style attention mask (True = masked out), shared over heads.
    row = jnp.arange(seq)[:, None]
    col = jnp.arange(seq)[None, :]
    attn_mask = jnp.broadcast_to(col > row, (batch, 1, seq, seq))

    fwd = jax.jit(multi_head_attention_forward, static_argnames=("n_head",))
    out, soft = fwd(Q, K, V, attn_mask, params, n_head=n_head)
    out = jax.block_until_ready(out)
    soft = jax.block_until_ready(soft)

    ref_out, ref_soft = reference_forward(Q, K, V, attn_mask, params, n_head)

    assert out.shape == (batch, seq, d_model)
    assert soft.shape == (batch, n_head, seq, seq)
    # Tolerances loosened vs the pure-f32 reference: MXU operands are bf16 (f32 acc),
    # the returned soft matrix is bf16, and the softmax uses the approximate EUP
    # reciprocal (rows sum to 1 within ~1e-3).
    assert jnp.allclose(out, ref_out, atol=2e-2, rtol=2e-2)
    assert jnp.allclose(soft.astype(jnp.float32), ref_soft, atol=2e-2, rtol=2e-2)

    print("KERNEL_OK")
</pallas_src>

<mosaic_0001>
module attributes {stable_mosaic.version = 11 : i64} {
  func.func @_qkv_proj_kernel(%arg0: i32, %arg1: i32, %arg2: i32, %arg3: memref<1x1x8x32xbf16, #tpu.memory_space<vmem>>, %arg4: memref<1x32x32xbf16, #tpu.memory_space<vmem>>, %arg5: memref<1x1x32xf32, #tpu.memory_space<vmem>>, %arg6: memref<1x1x4x8x8xbf16, #tpu.memory_space<vmem>>) attributes {dimension_semantics = [#tpu.dimension_semantics<parallel>, #tpu.dimension_semantics<parallel>, #tpu.dimension_semantics<parallel>], iteration_bounds = array<i64: 3, 2, 1>, scalar_prefetch = 0 : i64, scratch_operands = 0 : i64, tpu.core_type = #tpu.core_type<tc>, window_params = [{transform_indices = @transform_0, window_bounds = array<i64: 1, 1, 8, 32>}, {transform_indices = @transform_1, window_bounds = array<i64: 1, 32, 32>}, {transform_indices = @transform_2, window_bounds = array<i64: 1, 1, 32>}, {transform_indices = @transform_3, window_bounds = array<i64: 1, 1, 4, 8, 8>}]} {
    %c0 = arith.constant 0 : index
    %c0_0 = arith.constant 0 : index
    %c0_1 = arith.constant 0 : index
    %c0_2 = arith.constant 0 : index
    %0 = vector.load %arg3[%c0, %c0_0, %c0_1, %c0_2] : memref<1x1x8x32xbf16, #tpu.memory_space<vmem>>, vector<1x1x8x32xbf16>
    %1 = vector.shape_cast %0 : vector<1x1x8x32xbf16> to vector<8x32xbf16>
    %c0_3 = arith.constant 0 : index
    %c0_4 = arith.constant 0 : index
    %c0_5 = arith.constant 0 : index
    %2 = vector.load %arg4[%c0_3, %c0_4, %c0_5] : memref<1x32x32xbf16, #tpu.memory_space<vmem>>, vector<1x32x32xbf16>
    %3 = vector.shape_cast %2 : vector<1x32x32xbf16> to vector<32x32xbf16>
    %cst = arith.constant dense<0.000000e+00> : vector<8x32xf32>
    %4 = tpu.matmul %1, %3, %cst {dimension_numbers = #tpu.dot_dimension_numbers<[1], [0], [0], [1], [0, 0, 1, 1], [], []>} : vector<8x32xbf16>, vector<32x32xbf16>, vector<8x32xf32> -> vector<8x32xf32>
    %c0_6 = arith.constant 0 : index
    %c0_7 = arith.constant 0 : index
    %c0_8 = arith.constant 0 : index
    %5 = vector.load %arg5[%c0_6, %c0_7, %c0_8] : memref<1x1x32xf32, #tpu.memory_space<vmem>>, vector<1x1x32xf32>
    %6 = vector.shape_cast %5 : vector<1x1x32xf32> to vector<1x32xf32>
    %7 = vector.broadcast %6 : vector<1x32xf32> to vector<8x32xf32>
    %8 = arith.addf %4, %7 : vector<8x32xf32>
    %9 = arith.truncf %8 : vector<8x32xf32> to vector<8x32xbf16>
    %10 = vector.extract_strided_slice %9 {offsets = [0, 0], sizes = [8, 8], strides = [1, 1]} : vector<8x32xbf16> to vector<8x8xbf16>
    %c0_9 = arith.constant 0 : index
    %c0_10 = arith.constant 0 : index
    %c0_11 = arith.constant 0 : index
    %c0_12 = arith.constant 0 : index
    %c0_13 = arith.constant 0 : index
    %11 = vector.load %arg6[%c0_9, %c0_10, %c0_11, %c0_12, %c0_13] : memref<1x1x4x8x8xbf16, #tpu.memory_space<vmem>>, vector<1x1x1x8x8xbf16>
    %12 = vector.shape_cast %11 : vector<1x1x1x8x8xbf16> to vector<8x8xbf16>
    %13 = vector.shape_cast %10 : vector<8x8xbf16> to vector<1x1x1x8x8xbf16>
    tpu.vector_store %arg6[%c0_9, %c0_10, %c0_11, %c0_12, %c0_13], %13 {strides = array<i32>} : memref<1x1x4x8x8xbf16, #tpu.memory_space<vmem>>, vector<1x1x1x8x8xbf16>,
    %14 = vector.extract_strided_slice %9 {offsets = [0, 8], sizes = [8, 8], strides = [1, 1]} : vector<8x32xbf16> to vector<8x8xbf16>
    %c0_14 = arith.constant 0 : index
    %c0_15 = arith.constant 0 : index
    %c1 = arith.constant 1 : index
    %c0_16 = arith.constant 0 : index
    %c0_17 = arith.constant 0 : index
    %15 = vector.load %arg6[%c0_14, %c0_15, %c1, %c0_16, %c0_17] : memref<1x1x4x8x8xbf16, #tpu.memory_space<vmem>>, vector<1x1x1x8x8xbf16>
    %16 = vector.shape_cast %15 : vector<1x1x1x8x8xbf16> to vector<8x8xbf16>
    %17 = vector.shape_cast %14 : vector<8x8xbf16> to vector<1x1x1x8x8xbf16>
    tpu.vector_store %arg6[%c0_14, %c0_15, %c1, %c0_16, %c0_17], %17 {strides = array<i32>} : memref<1x1x4x8x8xbf16, #tpu.memory_space<vmem>>, vector<1x1x1x8x8xbf16>,
    %18 = vector.extract_strided_slice %9 {offsets = [0, 16], sizes = [8, 8], strides = [1, 1]} : vector<8x32xbf16> to vector<8x8xbf16>
    %c0_18 = arith.constant 0 : index
    %c0_19 = arith.constant 0 : index
    %c2 = arith.constant 2 : index
    %c0_20 = arith.constant 0 : index
    %c0_21 = arith.constant 0 : index
    %19 = vector.load %arg6[%c0_18, %c0_19, %c2, %c0_20, %c0_21] : memref<1x1x4x8x8xbf16, #tpu.memory_space<vmem>>, vector<1x1x1x8x8xbf16>
    %20 = vector.shape_cast %19 : vector<1x1x1x8x8xbf16> to vector<8x8xbf16>
    %21 = vector.shape_cast %18 : vector<8x8xbf16> to vector<1x1x1x8x8xbf16>
    tpu.vector_store %arg6[%c0_18, %c0_19, %c2, %c0_20, %c0_21], %21 {strides = array<i32>} : memref<1x1x4x8x8xbf16, #tpu.memory_space<vmem>>, vector<1x1x1x8x8xbf16>,
    %22 = vector.extract_strided_slice %9 {offsets = [0, 24], sizes = [8, 8], strides = [1, 1]} : vector<8x32xbf16> to vector<8x8xbf16>
    %c0_22 = arith.constant 0 : index
    %c0_23 = arith.constant 0 : index
    %c3 = arith.constant 3 : index
    %c0_24 = arith.constant 0 : index
    %c0_25 = arith.constant 0 : index
    %23 = vector.load %arg6[%c0_22, %c0_23, %c3, %c0_24, %c0_25] : memref<1x1x4x8x8xbf16, #tpu.memory_space<vmem>>, vector<1x1x1x8x8xbf16>
    %24 = vector.shape_cast %23 : vector<1x1x1x8x8xbf16> to vector<8x8xbf16>
    %25 = vector.shape_cast %22 : vector<8x8xbf16> to vector<1x1x1x8x8xbf16>
    tpu.vector_store %arg6[%c0_22, %c0_23, %c3, %c0_24, %c0_25], %25 {strides = array<i32>} : memref<1x1x4x8x8xbf16, #tpu.memory_space<vmem>>, vector<1x1x1x8x8xbf16>,
    return
  }
  func.func @transform_0(%arg0: i32, %arg1: i32, %arg2: i32) -> (i32, i32, i32, i32) {
    %c0_i32 = arith.constant 0 : i32
    %c0_i32_0 = arith.constant 0 : i32
    return %arg0, %arg1, %arg2, %c0_i32 : i32, i32, i32, i32
  }
  func.func @transform_1(%arg0: i32, %arg1: i32, %arg2: i32) -> (i32, i32, i32) {
    %c0_i32 = arith.constant 0 : i32
    %c0_i32_0 = arith.constant 0 : i32
    %c0_i32_1 = arith.constant 0 : i32
    return %arg0, %c0_i32, %c0_i32_0 : i32, i32, i32
  }
  func.func @transform_2(%arg0: i32, %arg1: i32, %arg2: i32) -> (i32, i32, i32) {
    %c0_i32 = arith.constant 0 : i32
    %c0_i32_0 = arith.constant 0 : i32
    %c0_i32_1 = arith.constant 0 : i32
    return %arg0, %c0_i32, %c0_i32_0 : i32, i32, i32
  }
  func.func @transform_3(%arg0: i32, %arg1: i32, %arg2: i32) -> (i32, i32, i32, i32, i32) {
    %c0_i32 = arith.constant 0 : i32
    %c0_i32_0 = arith.constant 0 : i32
    %c0_i32_1 = arith.constant 0 : i32
    return %arg0, %arg1, %c0_i32, %arg2, %c0_i32_0 : i32, i32, i32, i32, i32
  }
}

module attributes {stable_mosaic.version = 11 : i64} {
  func.func @_attention_kernel(%arg0: i32, %arg1: i32, %arg2: i32, %arg3: memref<1x1x1x8x8xbf16, #tpu.memory_space<vmem>>, %arg4: memref<1x1x1x8x8xbf16, #tpu.memory_space<vmem>>, %arg5: memref<1x1x1x8x8xbf16, #tpu.memory_space<vmem>>, %arg6: memref<1x8x8xi8, #tpu.memory_space<vmem>>, %arg7: memref<1x1x8x8xbf16, #tpu.memory_space<vmem>>, %arg8: memref<1x1x8x8xbf16, #tpu.memory_space<vmem>>) attributes {dimension_semantics = [#tpu.dimension_semantics<parallel>, #tpu.dimension_semantics<parallel>, #tpu.dimension_semantics<parallel>], iteration_bounds = array<i64: 2, 4, 1>, scalar_prefetch = 0 : i64, scratch_operands = 0 : i64, tpu.core_type = #tpu.core_type<tc>, window_params = [{transform_indices = @transform_0, window_bounds = array<i64: 1, 1, 1, 8, 8>}, {transform_indices = @transform_1, window_bounds = array<i64: 1, 1, 1, 8, 8>}, {transform_indices = @transform_2, window_bounds = array<i64: 1, 1, 1, 8, 8>}, {transform_indices = @transform_3, window_bounds = array<i64: 1, 8, 8>}, {transform_indices = @transform_4, window_bounds = array<i64: 1, 1, 8, 8>}, {transform_indices = @transform_5, window_bounds = array<i64: 1, 1, 8, 8>}]} {
    %c0 = arith.constant 0 : index
    %c0_0 = arith.constant 0 : index
    %c0_1 = arith.constant 0 : index
    %c0_2 = arith.constant 0 : index
    %c0_3 = arith.constant 0 : index
    %0 = vector.load %arg3[%c0, %c0_0, %c0_1, %c0_2, %c0_3] : memref<1x1x1x8x8xbf16, #tpu.memory_space<vmem>>, vector<1x1x1x8x8xbf16>
    %1 = vector.shape_cast %0 : vector<1x1x1x8x8xbf16> to vector<8x8xbf16>
    %c0_4 = arith.constant 0 : index
    %c0_5 = arith.constant 0 : index
    %c0_6 = arith.constant 0 : index
    %c0_7 = arith.constant 0 : index
    %c0_8 = arith.constant 0 : index
    %2 = vector.load %arg4[%c0_4, %c0_5, %c0_6, %c0_7, %c0_8] : memref<1x1x1x8x8xbf16, #tpu.memory_space<vmem>>, vector<1x1x1x8x8xbf16>
    %3 = vector.shape_cast %2 : vector<1x1x1x8x8xbf16> to vector<8x8xbf16>
    %c0_9 = arith.constant 0 : index
    %c0_10 = arith.constant 0 : index
    %c0_11 = arith.constant 0 : index
    %c0_12 = arith.constant 0 : index
    %c0_13 = arith.constant 0 : index
    %4 = vector.load %arg5[%c0_9, %c0_10, %c0_11, %c0_12, %c0_13] : memref<1x1x1x8x8xbf16, #tpu.memory_space<vmem>>, vector<1x1x1x8x8xbf16>
    %5 = vector.shape_cast %4 : vector<1x1x1x8x8xbf16> to vector<8x8xbf16>
    %c0_14 = arith.constant 0 : index
    %c0_15 = arith.constant 0 : index
    %c0_16 = arith.constant 0 : index
    %6 = vector.load %arg6[%c0_14, %c0_15, %c0_16] : memref<1x8x8xi8, #tpu.memory_space<vmem>>, vector<1x8x8xi8>
    %7 = vector.shape_cast %6 : vector<1x8x8xi8> to vector<8x8xi8>
    %cst = arith.constant dense<0.000000e+00> : vector<8x8xf32>
    %8 = tpu.matmul %1, %3, %cst {dimension_numbers = #tpu.dot_dimension_numbers<[1], [1], [0], [0], [0, 0, 1, 0], [], []>} : vector<8x8xbf16>, vector<8x8xbf16>, vector<8x8xf32> -> vector<8x8xf32>
    %c0_i8 = arith.constant 0 : i8
    %9 = vector.broadcast %c0_i8 : i8 to vector<8x8xi8>
    %10 = arith.cmpi ne, %7, %9 : vector<8x8xi8>
    %cst_17 = arith.constant -1.000000e+09 : f32
    %11 = vector.broadcast %cst_17 : f32 to vector<8x8xf32>
    %12 = arith.select %10, %11, %8 : vector<8x8xi1>, vector<8x8xf32>
    %cst_18 = arith.constant dense<0xFF800000> : vector<8xf32>
    %13 = vector.multi_reduction <maximumf>, %12, %cst_18 [1] : vector<8x8xf32> to vector<8xf32>
    %14 = vector.shape_cast %13 : vector<8xf32> to vector<8x1xf32>
    %15 = vector.broadcast %14 : vector<8x1xf32> to vector<8x8xf32>
    %16 = arith.subf %12, %15 : vector<8x8xf32>
    %17 = math.exp %16 : vector<8x8xf32>
    %cst_19 = arith.constant dense<0.000000e+00> : vector<8xf32>
    %18 = vector.multi_reduction <add>, %17, %cst_19 [1] : vector<8x8xf32> to vector<8xf32>
    %19 = vector.shape_cast %18 : vector<8xf32> to vector<8x1xf32>
    %20 = tpu.reciprocal %19 {approx = true} : vector<8x1xf32> -> vector<8x1xf32>
    %21 = vector.broadcast %20 : vector<8x1xf32> to vector<8x8xf32>
    %22 = arith.mulf %17, %21 : vector<8x8xf32>
    %23 = arith.truncf %22 : vector<8x8xf32> to vector<8x8xbf16>
    %c0_20 = arith.constant 0 : index
    %c0_21 = arith.constant 0 : index
    %c0_22 = arith.constant 0 : index
    %c0_23 = arith.constant 0 : index
    %24 = vector.load %arg8[%c0_20, %c0_21, %c0_22, %c0_23] : memref<1x1x8x8xbf16, #tpu.memory_space<vmem>>, vector<1x1x8x8xbf16>
    %25 = vector.shape_cast %24 : vector<1x1x8x8xbf16> to vector<8x8xbf16>
    %26 = vector.shape_cast %23 : vector<8x8xbf16> to vector<1x1x8x8xbf16>
    tpu.vector_store %arg8[%c0_20, %c0_21, %c0_22, %c0_23], %26 {strides = array<i32>} : memref<1x1x8x8xbf16, #tpu.memory_space<vmem>>, vector<1x1x8x8xbf16>,
    %cst_24 = arith.constant dense<0.000000e+00> : vector<8x8xf32>
    %27 = tpu.matmul %23, %5, %cst_24 {dimension_numbers = #tpu.dot_dimension_numbers<[1], [0], [0], [1], [0, 0, 1, 1], [], []>} : vector<8x8xbf16>, vector<8x8xbf16>, vector<8x8xf32> -> vector<8x8xf32>
    %28 = arith.truncf %27 : vector<8x8xf32> to vector<8x8xbf16>
    %c0_25 = arith.constant 0 : index
    %c0_26 = arith.constant 0 : index
    %c0_27 = arith.constant 0 : index
    %c0_28 = arith.constant 0 : index
    %29 = vector.load %arg7[%c0_25, %c0_26, %c0_27, %c0_28] : memref<1x1x8x8xbf16, #tpu.memory_space<vmem>>, vector<1x1x8x8xbf16>
    %30 = vector.shape_cast %29 : vector<1x1x8x8xbf16> to vector<8x8xbf16>
    %31 = vector.shape_cast %28 : vector<8x8xbf16> to vector<1x1x8x8xbf16>
    tpu.vector_store %arg7[%c0_25, %c0_26, %c0_27, %c0_28], %31 {strides = array<i32>} : memref<1x1x8x8xbf16, #tpu.memory_space<vmem>>, vector<1x1x8x8xbf16>,
    return
  }
  func.func @transform_0(%arg0: i32, %arg1: i32, %arg2: i32) -> (i32, i32, i32, i32, i32) {
    %c0_i32 = arith.constant 0 : i32
    %c0_i32_0 = arith.constant 0 : i32
    %c0_i32_1 = arith.constant 0 : i32
    return %c0_i32, %arg0, %arg1, %arg2, %c0_i32_0 : i32, i32, i32, i32, i32
  }
  func.func @transform_1(%arg0: i32, %arg1: i32, %arg2: i32) -> (i32, i32, i32, i32, i32) {
    %c1_i32 = arith.constant 1 : i32
    %c0_i32 = arith.constant 0 : i32
    %c0_i32_0 = arith.constant 0 : i32
    %c0_i32_1 = arith.constant 0 : i32
    return %c1_i32, %arg0, %arg1, %c0_i32, %c0_i32_0 : i32, i32, i32, i32, i32
  }
  func.func @transform_2(%arg0: i32, %arg1: i32, %arg2: i32) -> (i32, i32, i32, i32, i32) {
    %c2_i32 = arith.constant 2 : i32
    %c0_i32 = arith.constant 0 : i32
    %c0_i32_0 = arith.constant 0 : i32
    %c0_i32_1 = arith.constant 0 : i32
    return %c2_i32, %arg0, %arg1, %c0_i32, %c0_i32_0 : i32, i32, i32, i32, i32
  }
  func.func @transform_3(%arg0: i32, %arg1: i32, %arg2: i32) -> (i32, i32, i32) {
    %c0_i32 = arith.constant 0 : i32
    %c0_i32_0 = arith.constant 0 : i32
    return %arg0, %arg2, %c0_i32 : i32, i32, i32
  }
  func.func @transform_4(%arg0: i32, %arg1: i32, %arg2: i32) -> (i32, i32, i32, i32) {
    %c0_i32 = arith.constant 0 : i32
    %c0_i32_0 = arith.constant 0 : i32
    return %arg0, %arg1, %arg2, %c0_i32 : i32, i32, i32, i32
  }
  func.func @transform_5(%arg0: i32, %arg1: i32, %arg2: i32) -> (i32, i32, i32, i32) {
    %c0_i32 = arith.constant 0 : i32
    %c0_i32_0 = arith.constant 0 : i32
    return %arg0, %arg1, %arg2, %c0_i32 : i32, i32, i32, i32
  }
}

module attributes {stable_mosaic.version = 11 : i64} {
  func.func @_out_proj_kernel(%arg0: i32, %arg1: i32, %arg2: i32, %arg3: memref<1x1x8x8xbf16, #tpu.memory_space<vmem>>, %arg4: memref<1x8x32xbf16, #tpu.memory_space<vmem>>, %arg5: memref<1x32xf32, #tpu.memory_space<vmem>>, %arg6: memref<1x8x32xf32, #tpu.memory_space<vmem>>, %arg7: memref<8x32xf32, #tpu.memory_space<vmem>>) attributes {dimension_semantics = [#tpu.dimension_semantics<parallel>, #tpu.dimension_semantics<parallel>, #tpu.dimension_semantics<arbitrary>], iteration_bounds = array<i64: 2, 1, 4>, scalar_prefetch = 0 : i64, scratch_operands = 1 : i64, tpu.core_type = #tpu.core_type<tc>, window_params = [{transform_indices = @transform_0, window_bounds = array<i64: 1, 1, 8, 8>}, {transform_indices = @transform_1, window_bounds = array<i64: 1, 8, 32>}, {pipeline_mode = #tpu.pipeline_mode<synchronous>, transform_indices = @transform_2, window_bounds = array<i64: 1, 32>}, {transform_indices = @transform_3, window_bounds = array<i64: 1, 8, 32>}]} {
    %c0_i32 = arith.constant 0 : i32
    %0 = arith.cmpi eq, %arg2, %c0_i32 : i32
    %1 = arith.extui %0 : i1 to i32
    %c0_i32_0 = arith.constant 0 : i32
    %2 = arith.cmpi ne, %1, %c0_i32_0 : i32
    scf.if %2 {
      %cst_12 = arith.constant 0.000000e+00 : f32
      %14 = vector.broadcast %cst_12 : f32 to vector<8x32xf32>
      %c0_13 = arith.constant 0 : index
      %c0_14 = arith.constant 0 : index
      %15 = vector.load %arg7[%c0_13, %c0_14] : memref<8x32xf32, #tpu.memory_space<vmem>>, vector<8x32xf32>
      tpu.vector_store %arg7[%c0_13, %c0_14], %14 {strides = array<i32>} : memref<8x32xf32, #tpu.memory_space<vmem>>, vector<8x32xf32>,
    } else {
    }
    %c0 = arith.constant 0 : index
    %c0_1 = arith.constant 0 : index
    %3 = vector.load %arg7[%c0, %c0_1] : memref<8x32xf32, #tpu.memory_space<vmem>>, vector<8x32xf32>
    %c0_2 = arith.constant 0 : index
    %c0_3 = arith.constant 0 : index
    %c0_4 = arith.constant 0 : index
    %c0_5 = arith.constant 0 : index
    %4 = vector.load %arg3[%c0_2, %c0_3, %c0_4, %c0_5] : memref<1x1x8x8xbf16, #tpu.memory_space<vmem>>, vector<1x1x8x8xbf16>
    %5 = vector.shape_cast %4 : vector<1x1x8x8xbf16> to vector<8x8xbf16>
    %c0_6 = arith.constant 0 : index
    %c0_7 = arith.constant 0 : index
    %c0_8 = arith.constant 0 : index
    %6 = vector.load %arg4[%c0_6, %c0_7, %c0_8] : memref<1x8x32xbf16, #tpu.memory_space<vmem>>, vector<1x8x32xbf16>
    %7 = vector.shape_cast %6 : vector<1x8x32xbf16> to vector<8x32xbf16>
    %cst = arith.constant dense<0.000000e+00> : vector<8x32xf32>
    %8 = tpu.matmul %5, %7, %cst {dimension_numbers = #tpu.dot_dimension_numbers<[1], [0], [0], [1], [0, 0, 1, 1], [], []>} : vector<8x8xbf16>, vector<8x32xbf16>, vector<8x32xf32> -> vector<8x32xf32>
    %9 = arith.addf %3, %8 : vector<8x32xf32>
    %c0_9 = arith.constant 0 : index
    %c0_10 = arith.constant 0 : index
    %10 = vector.load %arg7[%c0_9, %c0_10] : memref<8x32xf32, #tpu.memory_space<vmem>>, vector<8x32xf32>
    tpu.vector_store %arg7[%c0_9, %c0_10], %9 {strides = array<i32>} : memref<8x32xf32, #tpu.memory_space<vmem>>, vector<8x32xf32>,
    %c3_i32 = arith.constant 3 : i32
    %11 = arith.cmpi eq, %arg2, %c3_i32 : i32
    %12 = arith.extui %11 : i1 to i32
    %c0_i32_11 = arith.constant 0 : i32
    %13 = arith.cmpi ne, %12, %c0_i32_11 : i32
    scf.if %13 {
      %c0_12 = arith.constant 0 : index
      %c0_13 = arith.constant 0 : index
      %14 = vector.load %arg7[%c0_12, %c0_13] : memref<8x32xf32, #tpu.memory_space<vmem>>, vector<8x32xf32>
      %c0_14 = arith.constant 0 : index
      %c0_15 = arith.constant 0 : index
      %15 = vector.load %arg5[%c0_14, %c0_15] : memref<1x32xf32, #tpu.memory_space<vmem>>, vector<1x32xf32>
      %16 = vector.broadcast %15 : vector<1x32xf32> to vector<8x32xf32>
      %17 = arith.addf %14, %16 : vector<8x32xf32>
      %c0_16 = arith.constant 0 : index
      %c0_17 = arith.constant 0 : index
      %c0_18 = arith.constant 0 : index
      %18 = vector.load %arg6[%c0_16, %c0_17, %c0_18] : memref<1x8x32xf32, #tpu.memory_space<vmem>>, vector<1x8x32xf32>
      %19 = vector.shape_cast %18 : vector<1x8x32xf32> to vector<8x32xf32>
      %20 = vector.shape_cast %17 : vector<8x32xf32> to vector<1x8x32xf32>
      tpu.vector_store %arg6[%c0_16, %c0_17, %c0_18], %20 {strides = array<i32>} : memref<1x8x32xf32, #tpu.memory_space<vmem>>, vector<1x8x32xf32>,
    } else {
    }
    return
  }
  func.func @transform_0(%arg0: i32, %arg1: i32, %arg2: i32) -> (i32, i32, i32, i32) {
    %c0_i32 = arith.constant 0 : i32
    %c0_i32_0 = arith.constant 0 : i32
    return %arg0, %arg2, %arg1, %c0_i32 : i32, i32, i32, i32
  }
  func.func @transform_1(%arg0: i32, %arg1: i32, %arg2: i32) -> (i32, i32, i32) {
    %c0_i32 = arith.constant 0 : i32
    %c0_i32_0 = arith.constant 0 : i32
    %c0_i32_1 = arith.constant 0 : i32
    return %arg2, %c0_i32, %c0_i32_0 : i32, i32, i32
  }
  func.func @transform_2(%arg0: i32, %arg1: i32, %arg2: i32) -> (i32, i32) {
    %c0_i32 = arith.constant 0 : i32
    %c0_i32_0 = arith.constant 0 : i32
    %c0_i32_1 = arith.constant 0 : i32
    return %c0_i32, %c0_i32_0 : i32, i32
  }
  func.func @transform_3(%arg0: i32, %arg1: i32, %arg2: i32) -> (i32, i32, i32) {
    %c0_i32 = arith.constant 0 : i32
    %c0_i32_0 = arith.constant 0 : i32
    return %arg0, %arg1, %c0_i32 : i32, i32, i32
  }
}

</mosaic_0001>

<bundles_post_ra>
// kernel: multi_head_attention_forward.4
= control target key start
LH: loop header
LB: loop body
LE: loop exit
PB: predicated region body
PF: predicated region fallthrough
CT: control target
= control target key end

     0   :  { %s1053_s0 = inlined_call_operand.vmem [shape: bf16[3,2,4,8,8], index: 0, kind: input, shape index: {}, may-alias: {0,1,2}]   ;;  %s1054_s1 = inlined_call_operand.vmem [shape: bf16[3,2,4,8,8], index: 1, kind: input, shape index: {}, may-alias: {0,1,2}]   ;;  %s1055_s2 = inlined_call_operand.vmem [shape: bf16[3,2,4,8,8], index: 2, kind: input, shape index: {}, may-alias: {0,1,2}]   ;;  %s1056_s3 = inlined_call_operand.vmem [shape: s8[2,8,8], index: 3, kind: input, shape index: {}]   ;;  %s1057_s4 = inlined_call_operand.vmem [shape: bf16[2,4,8,8], index: 4, kind: output, shape index: {0}]   ;;  %s1058_s5 = inlined_call_operand.hbm [shape: bf16[2,4,8,8], index: 5, kind: output, shape index: {1}]  }
   0x1   :  { %1059 = sst [smem:[#allocation5_spill]] %s1053_s0 }
   0x2   :  { %1060 = sst [smem:[#allocation6_spill]] %s1054_s1 }
   0x3   :  { %1061 = sst [smem:[#allocation7_spill]] %s1055_s2 }
   0x4   :  { %11 = vsyncpa [#allocation3], 0 }
   0x5   :  { %13 = vsyncpa [#allocation3 + $0x1], 0  ;;  %s906_s18 = smov 0   ;;  %s908_s19 = smov 0  }
   0x6   :  { %s910_s20 = smov 0   ;;  %s912_s21 = smov 0  }
   0x7   :  { %s914_s22 = smov 0   ;;  %s916_s23 = smov 0  }
   0x8   :  { %s918_s24 = smov 0   ;;  %s920_s25 = smov 0  }
   0x9 LB: > { %s679_s26 = sadd.s32 4294967295, %s873_s25   ;;  %s680_s27 = sadd.s32 4294967294, %s873_s25   ;;  %s873_s25 = sphi %s920_s25, %s19_s25   ;;  %s869_s24 = sphi %s918_s24, %s1073_s24   ;;  %s865_s23 = sphi %s916_s23, %s1072_s23   ;;  %s861_s22 = sphi %s914_s22, %s1071_s22   ;;  %s857_s21 = sphi %s912_s21, %s1070_s21   ;;  %s853_s20 = sphi %s910_s20, %s1069_s20   ;;  %s849_s19 = sphi %s908_s19, %s1068_s19   ;;  %s845_s18 = sphi %s906_s18, %s1067_s18  }
   0xa   : > { %s34_s28 = sadd.s32 1, %s865_s23  ;;  %s38_s29 = sadd.s32 1, %s869_s24 }
   0xb   : > { %p36_p0 = scmp.ge.s32.totalorder %s34_s28, 4  ;;  %p203_p1 = scmp.ne.s32.totalorder %s853_s20, %s849_s19 }
   0xc   : > { %p204_p2 = scmp.eq.s32.totalorder %s679_s26, 7  ;;  %p209_p5 = scmp.ne.s32.totalorder %s849_s19, %s845_s18 }
   0xd   : > { %s1075_s28 = smov (%p36_p0, %s34_s28), 0  ;;  %s1077_s29 = smov (!%p36_p0, %s38_s29), %s869_s24 }
   0xe   : > { %s187_s30 = ssub.s32 %s865_s23, %s1075_s28  ;;  %p957_p3 = por %p204_p2, %p203_p1 }
   0xf   : > { %p40_p4 = scmp.ge.s32.totalorder %s1077_s29, 2  ;;  %p210_p6 = scmp.eq.s32.totalorder %s680_s27, 7 }
  0x10   : > { %p683_p7 = scmp.ge.s32.totalorder %s873_s25, 1  ;;  %p276_p9 = scmp.lt.s32.totalorder %s873_s25, 9 }
  0x11   : > { %s1079_s29 = smov (%p40_p4, %s1077_s29), 0  ;;  %p966_p8 = por %p210_p6, %p209_p5 }
  0x12   : > { %s186_s8 = ssub.s32 %s869_s24, %s1079_s29  ;;  %s193_s9 = sadd.s32 1, %s853_s20 }
  0x13   : > { %s188_s10 = sor.u32 %s187_s30, %s186_s8  ;;  %p277_p10 = pnand %p683_p7, %p276_p9 }
  0x14   : > { %p191_p11 = scmp.eq.s32.totalorder %s188_s10, 0  ;;  %p346_p12 = scmp.lt.s32.totalorder (!%p277_p10), %s861_s22, 1 }
  0x15   : > { %280 = sbr.rel (%p277_p10) target bundleno = 558 (0x22e), region = 36  ;;  %p348_p13 = scmp.lt.s32.totalorder (!%p277_p10), %s857_s21, 3 }
  0x16   : > { %s975_s11 = scalar_select %p191_p11, %s853_s20, %s193_s9  }
  0x17   : > { %s1064_s1 = sld [smem:[#allocation6_spill]] (!%p277_p10)  ;;  %s699_s8 = sshll.u32 (!%p277_p10), %s861_s22, 2 }
  0x18   : > { %s1065_s0 = sld [smem:[#allocation5_spill]] (!%p277_p10) }
  0x19   : > { %s1066_s2 = sld [smem:[#allocation7_spill]] (!%p277_p10) }
  0x1a   : > { %s347_s12 = scalar_select %p346_p12, %s861_s22, 1  ;;  %vm400_vm0 = vcmask 64512   ;;  %v875_v4 = vmov 0   ;;  %vm442_vm3 = vcmask 1043456   ;;  %vm437_vm4 = vcmask 60416  }
  0x1b   : > { %s349_s13 = scalar_select %p348_p13, %s857_s21, 3 }
  0x1c   : > { %s685_s14 = sshll.u32 %s347_s12, 2  ;;  %s691_s10 = sshll.u32 %s347_s12, 1 }
  0x1d   : > { %s354_s15 = sadd.s32 %s685_s14, %s349_s13 }
  0x1e   : > { %s981_s16 = sshll.u32 %s354_s15, 2  ;;  %s381_s15 = scalar_lea.vmem %s1056_s3, %s691_s10 }
  0x1f   : > { %s581_s27 = scalar_lea.vmem %s1064_s1, %s981_s16  ;;  %s356_s9 = scalar_lea.vmem %s1065_s0, %s981_s16  ;;  %v399_v3 = vld [vmem:[%s381_s15] sm:$0x3] }
  0x20   : > { %v694_v0 = vld [vmem:[%s581_s27 + $0x20] sm:$0xf]  ;;  %vm420_vm1 = vnez %v399_v3  ;;  %s586_s26 = scalar_lea.vmem %s1066_s2, %s981_s16  ;;  %s343_s27 = sand.u32 1, %s849_s19  }
  0x21   : > { %v405_v1 = vsel %vm400_vm0, %v694_v0, 0  ;;  %v396_v2 = vld [vmem:[%s356_s9] sm:$0xf]  ;;  %v421_v5 = vsel %vm420_vm1, 16843009, %v875_v4  ;;  %s684_s30 = sshll.u32 %s343_s27, 2  ;;  %s487_s10 = sadd.s32 %s857_s21, %s699_s8 }
  0x22   : > { %414 = vmatpush.bf16.xpose.msra.mxu0 %v405_v1  ;;  %v422_v6 = vunpack.c.0.s8 %v421_v5  ;;  %v695_v16 = vld [vmem:[%s586_s26 + $0x40] sm:$0xf]  ;;  %s345_s9 = scalar_lea.vmem [#allocation2], %s684_s30  ;;  %s700_s13 = sshll.u32 %s487_s10, 2 }
  0x23   : > { %v444_v17 = vsel %vm442_vm3, %v695_v16, 0  ;;  %s489_s12 = scalar_lea.hbm %s1058_s5, %s700_s13  ;;  %s491_s17 = sshll.u32 %s345_s9, 4  ;;  %s492_s17 = int_to_ptr.vmem [resolvable:$true] %s491_s17 }
  0x24   : > { %vm423_vm2 = vcmp.ne.s32.totalorder %v422_v6, 0  ;;  %453 = vmatpush.bf16.msra.mxu1 %v444_v17  ;;  %s493_s26 = sshll.u32 %s489_s12, 4  ;;  %s473_s0 = scalar_lea.sflag [#allocation3], %s343_s27  ;;  %s494_s26 = int_to_ptr.hbm [resolvable:$true] %s493_s26 }
  0x25   : > { %s793_s1 = sshra.s32 %s494_s26, 4  ;;  %s799_s21 = scalar_lea.hbm %s1058_s5, 32  ;;  %s794_s1 = int_to_ptr.hbm [resolvable:$true] %s793_s1 }
  0x26   : > { %s795_s22 = scalar_lea.hbm %s794_s1, 4  ;;  %p800_p4 = scmp.lt.s32.totalorder %s794_s1, %s1058_s5 }
  0x27   : > { %p796_p0 = scmp.ne.s32.totalorder %s794_s1, %s795_s22  ;;  %p801_p5 = scmp.lt.s32.totalorder %s799_s21, %s795_s22 }
  0x29   : > { %696 = vmatmul.msk.bf16.vlgmr.msra.gmra.mxu0 %vm400_vm0, %v396_v2  ;;  %p797_p1 = pnand %p796_p0, %p957_p3  ;;  %p802_p6 = por %p801_p5, %p800_p4 }
  0x2b   : > { %p798_p2 = pneg %p797_p1 }
  0x2d   : > { %p803_p7 = pnand %p802_p6, %p798_p2 }
  0xa6   : > { %v416_v7 = vpop.f32.mrf.mxu0 }
  0xa7   : > { %v424_v8 = vsel %vm423_vm2, -1e+09, %v416_v7 }
  0xa8   : > { %v425_v9 = vsel %vm400_vm0, %v424_v8, -inf }
  0xa9   : > { %426 = vmax.xlane.f32.xlu0 %v425_v9 }
  0xae   : > { %v418_v10 = vpop.f32.mrf.mxu0 }
 0x11c   : > { %v427_v11 = vpop.xlane.xlu0 %426 }
 0x11d   : > { %v428_v12 = vsub.f32 %v424_v8, %v427_v11 }
 0x11f   : > { %v429_v13 = vmul.f32 1.442695, %v428_v12 }
 0x121   : > { %775 = vpow2.f32 %v429_v13 }
 0x127   : > { %v776_v14 = vpop.eup %775 }
 0x128   : > { %v431_v15 = vsel %vm400_vm0, %v776_v14, 0.0 }
 0x129   : > { %432 = vadd.xlane.f32.xlu0 %v431_v15 }
 0x19c   : > { %v433_v18 = vpop.xlane.xlu0 %432 }
 0x19d   : > { %777 = vrcp.f32 %v433_v18 }
 0x1a3   : > { %v778_v19 = vpop.eup %777 }
 0x1a4   : > { %v435_v20 = vmul.f32 %v778_v19, %v776_v14 }
 0x1a6   : > { %v436_v21 = vpack.c.bf16 %v435_v20, %v435_v20 }
 0x1a8   : > { %697 = vmatmul.msk.bf16.vlgmr.msra.gmra.mxu1 %vm400_vm0, %v436_v21  ;;  %438 = vst.msk [vmem:[%s345_s9] sm:$0xf] %vm437_vm4, %v436_v21 }
 0x1a9   : > { %806 = shalt.err (!%p803_p7)
}
 0x1aa   : > { %703 = dma.vmem_to_hbm [thread:$0]  (%p957_p3), %s492_s17, 64, %s494_s26, %s473_s0  }
 0x1ab   : > { %s392_s13 = scalar_lea.vmem %s1057_s4, %s981_s16 }
 0x225   : > { %v455_v22 = vpop.f32.mrf.mxu1 }
 0x226   : > { %v459_v23 = vpack.c.bf16 %v455_v22, %v455_v22 }
 0x228   : > { %460 = vst.msk [vmem:[%s392_s13] sm:$0xf] %vm437_vm4, %v459_v23 }
 0x22d   : > { %v457_v24 = vpop.f32.mrf.mxu1 }
 0x22e PF: > { %p709_p9 = scmp.ge.s32.totalorder %s873_s25, 2  ;;  %s519_s1 = sand.u32 1, %s845_s18  }
 0x22f   : > { %s520_s2 = scalar_lea.sflag [#allocation3], %s519_s1 }
 0x230   : > { %p706_p10 = pnand %p709_p9, %p966_p8 }
 0x232   : > { %p707_p11 = pneg %p706_p10 }
 0x234   : > { %840 = dma.done.wait (%p707_p11), %s520_s2, 64  }
 0x235   : > { %842 = vsyncadd (%p707_p11), %s520_s2, 4294967232  ;;  %s19_s25 = sadd.s32 1, %s873_s25   ;;  %s1067_s18 = smov %s849_s19 }
 0x236   : > { %p16_p3 = scmp.ge.s32.totalorder %s19_s25, 10   ;;  %s1068_s19 = smov %s853_s20 }
 0x237   : > { %s1069_s20 = smov %s975_s11  ;;  %s1070_s21 = smov %s865_s23 }
 0x238   : > { %s1071_s22 = smov %s869_s24  ;;  %s1072_s23 = smov %s1075_s28 }
 0x239   : > { %s1073_s24 = smov %s1079_s29  ;;  %18 = sbr.rel (!%p16_p3) target bundleno = 9 (0x9), region = 92 }
 0x23e   :  { %526 = vsyncpa [#allocation3], 1 }
 0x23f   :  { %528 = vsyncpa [#allocation3 + $0x1], 1 }

// kernel: multi_head_attention_forward.5
= control target key start
LH: loop header
LB: loop body
LE: loop exit
PB: predicated region body
PF: predicated region fallthrough
CT: control target
= control target key end

     0   :  { %8 = vsyncpa [#allocation4], 0  ;;  %s730_s0 = inlined_call_operand.vmem [shape: bf16[2,4,8,8], index: 0, kind: input, shape index: {}]   ;;  %s731_s1 = inlined_call_operand.vmem [shape: bf16[4,8,32], index: 1, kind: input, shape index: {}]   ;;  %s732_s2 = inlined_call_operand.vmem [shape: f32[1,32], index: 2, kind: input, shape index: {}]   ;;  %s733_s3 = inlined_call_operand.hbm [shape: f32[2,8,32], index: 3, kind: output, shape index: {}]  }
   0x1   :  { %10 = vsyncpa [#allocation4 + $0x1], 0  ;;  %s592_s12 = smov 0   ;;  %s594_s13 = smov 0  }
   0x2   :  { %s596_s14 = smov 0   ;;  %s598_s15 = smov 0  }
   0x3   :  { %s600_s16 = smov 0   ;;  %s602_s17 = smov 0  }
   0x4   :  { %s604_s18 = smov 0   ;;  %s606_s19 = smov 0  }
   0x5 LB: > { %s386_s20 = sadd.s32 4294967295, %s569_s19   ;;  %s387_s21 = sadd.s32 4294967294, %s569_s19   ;;  %s569_s19 = sphi %s606_s19, %s16_s19   ;;  %s565_s18 = sphi %s604_s18, %s745_s18   ;;  %s561_s17 = sphi %s602_s17, %s744_s17   ;;  %s557_s16 = sphi %s600_s16, %s743_s16   ;;  %s553_s15 = sphi %s598_s15, %s742_s15   ;;  %s549_s14 = sphi %s596_s14, %s741_s14   ;;  %s545_s13 = sphi %s594_s13, %s740_s13   ;;  %s541_s12 = sphi %s592_s12, %s739_s12  }
   0x6   : > { %s28_s22 = sadd.s32 1, %s561_s17  ;;  %s35_s23 = sadd.s32 1, %s565_s18 }
   0x7   : > { %p29_p0 = scmp.ge.s32.totalorder %s28_s22, 4  ;;  %p131_p1 = scmp.ne.s32.totalorder %s549_s14, %s545_s13 }
   0x8   : > { %p132_p2 = scmp.eq.s32.totalorder %s386_s20, 7  ;;  %p137_p4 = scmp.ne.s32.totalorder %s545_s13, %s541_s12 }
   0x9   : > { %s747_s22 = smov (%p29_p0, %s28_s22), 0  ;;  %s749_s23 = smov (!%p29_p0, %s35_s23), %s565_s18 }
   0xa   : > { %p641_p3 = por %p132_p2, %p131_p1  ;;  %p37_p5 = scmp.ge.s32.totalorder %s749_s23, 2 }
   0xb   : > { %p138_p6 = scmp.eq.s32.totalorder %s387_s21, 7  ;;  %p390_p7 = scmp.ge.s32.totalorder %s569_s19, 1 }
   0xc   : > { %p180_p8 = scmp.lt.s32.totalorder %s569_s19, 9  ;;  %s751_s23 = smov (%p37_p5, %s749_s23), 0 }
   0xd   : > { %736 = sst [smem:[#allocation6_spill]] %s751_s23  ;;  %p651_p9 = por %p138_p6, %p137_p4 }
   0xe   : > { %p181_p10 = pnand %p390_p7, %p180_p8  ;;  %s116_s26 = ssub.s32 %s565_s18, %s751_s23 }
   0xf   : > { %s121_s27 = sadd.s32 1, %s549_s14  ;;  %p119_p11 = scmp.eq.s32.totalorder %s116_s26, 0 }
  0x10   : > { %184 = sbr.rel (%p181_p10) target bundleno = 189 (0xbd), region = 32  ;;  %s211_s29 = sand.u32 (!%p181_p10), 1, %s545_s13  }
  0x11   : > { %s659_s28 = scalar_select %p119_p11, %s549_s14, %s121_s27  }
  0x12   : > { %p214_p12 = scmp.lt.s32.totalorder (!%p181_p10), %s557_s16, 1  ;;  %s665_s30 = sshll.u32 (!%p181_p10), %s211_s29, 3 }
  0x13   : > { %p216_p13 = scmp.lt.s32.totalorder (!%p181_p10), %s553_s15, 3  ;;  %s213_s23 = scalar_lea.vmem (!%p181_p10), [#allocation3], %s665_s30 }
  0x14   : > { %p395_p0 = scmp.ne.s32.totalorder (!%p181_p10), %s553_s15, 0 }
  0x15   : > { %s215_s4 = scalar_select %p214_p12, %s557_s16, 1 }
  0x16   : > { %s217_s5 = scalar_select %p216_p13, %s553_s15, 3 }
  0x17   : > { %s392_s6 = sshll.u32 %s215_s4, 2  ;;  %233 = sbr.rel (%p395_p0) target bundleno = 30 (0x1e), region = 36 }
  0x18   : > { %s222_s7 = sadd.s32 %s392_s6, %s217_s5  ;;  %s394_s8 = sshll.u32 %s217_s5, 2 }
  0x19   : > { %s393_s9 = sshll.u32 %s222_s7, 2  ;;  %s228_s20 = scalar_lea.vmem %s731_s1, %s394_s8 }
  0x1a   : > { %s224_s27 = scalar_lea.vmem %s730_s0, %s393_s9 }
  0x1c   : > { %vm234_vm0 = vcmask 261120   ;;  %v571_v0 = vmov 0.0  }
  0x1d   : > { %235 = vst.msk [vmem:[#allocation2] sm:$0xff] %vm234_vm0, %v571_v0 }
  0x1e PF: > { %v238_v1 = vld [vmem:[%s228_s20] sm:$0xf]  ;;  %vm243_vm1 = vcmask 1043456   ;;  %vm239_vm2 = vcmask 64512   ;;  %vm261_vm3 = vcmask 261120   ;;  %p397_p1 = scmp.ne.s32.totalorder %s553_s15, 3 }
  0x1f   : > { %v245_v2 = vsel %vm243_vm1, %v238_v1, 0  ;;  %v237_v3 = vld [vmem:[%s224_s27] sm:$0xf] }
  0x20   : > { %254 = vmatpush.bf16.msra.mxu0 %v245_v2 }
  0x23   : > { %396 = vmatmul.msk.bf16.vlgmr.msra.gmra.mxu0 %vm239_vm2, %v237_v3 }
  0x24   : > { %v236_v4 = vld [vmem:[#allocation2] sm:$0xff] }
  0xa0   : > { %v256_v5 = vpop.f32.mrf.mxu0 }
  0xa1   : > { %v260_v6 = vadd.f32 %v256_v5, %v236_v4 }
  0xa3   : > { %262 = vst.msk [vmem:[#allocation2] sm:$0xff] %vm261_vm3, %v260_v6 }
  0xa4   : > { %266 = sbr.rel (%p397_p1) target bundleno = 174 (0xae), region = 40 }
  0xa8   : > { %v258_v7 = vpop.f32.mrf.mxu0 }
  0xa9   : > { %v474_v9 = vld [vmem:[%s732_s2] ss:$0 sm:$0xff] }
  0xaa   : > { %v267_v8 = vld [vmem:[#allocation2] sm:$0xff] }
  0xab   : > { %v272_v10 = vadd.f32 %v474_v9, %v267_v8 }
  0xad   : > { %273 = vst.msk [vmem:[%s213_s23] sm:$0xff] %vm261_vm3, %v272_v10 }
  0xae PF: > { %s399_s6 = sshll.u32 %s557_s16, 3  ;;  %s288_s9 = sshll.u32 %s213_s23, 4  ;;  %s289_s9 = int_to_ptr.vmem [resolvable:$true] %s288_s9 }
  0xaf   : > { %s286_s15 = scalar_lea.hbm %s733_s3, %s399_s6  ;;  %s275_s11 = scalar_lea.sflag [#allocation4], %s211_s29 }
  0xb0   : > { %s290_s10 = sshll.u32 %s286_s15, 4  ;;  %s495_s27 = scalar_lea.hbm %s733_s3, 16  ;;  %s291_s10 = int_to_ptr.hbm [resolvable:$true] %s290_s10 }
  0xb1   : > { %s489_s20 = sshra.s32 %s291_s10, 4  ;;  %s490_s20 = int_to_ptr.hbm [resolvable:$true] %s489_s20 }
  0xb2   : > { %s491_s21 = scalar_lea.hbm %s490_s20, 8  ;;  %p496_p6 = scmp.lt.s32.totalorder %s490_s20, %s733_s3 }
  0xb3   : > { %p492_p2 = scmp.ne.s32.totalorder %s490_s20, %s491_s21  ;;  %p497_p7 = scmp.lt.s32.totalorder %s495_s27, %s491_s21 }
  0xb5   : > { %p493_p4 = pnand %p492_p2, %p641_p3  ;;  %p498_p8 = por %p497_p7, %p496_p6 }
  0xb7   : > { %p494_p5 = pneg %p493_p4 }
  0xb9   : > { %p499_p10 = pnand %p498_p8, %p494_p5 }
  0xbb   : > { %502 = shalt.err (!%p499_p10)
}
  0xbc   : > { %402 = dma.vmem_to_hbm [thread:$0]  (%p641_p3), %s289_s9, 128, %s291_s10, %s275_s11  }
  0xbd PF: > { %p408_p11 = scmp.ge.s32.totalorder %s569_s19, 2  ;;  %s302_s23 = sand.u32 1, %s541_s12  }
  0xbe   : > { %s303_s29 = scalar_lea.sflag [#allocation4], %s302_s23 }
  0xbf   : > { %p405_p12 = pnand %p408_p11, %p651_p9 }
  0xc1   : > { %p406_p13 = pneg %p405_p12 }
  0xc3   : > { %536 = dma.done.wait (%p406_p13), %s303_s29, 128  }
  0xc4   : > { %538 = vsyncadd (%p406_p13), %s303_s29, 4294967168  ;;  %s16_s19 = sadd.s32 1, %s569_s19   ;;  %s738_s24 = sld [smem:[#allocation6_spill]] }
  0xc5   : > { %p13_p0 = scmp.ge.s32.totalorder %s16_s19, 10   ;;  %s739_s12 = smov %s545_s13 }
  0xc6   : > { %s740_s13 = smov %s549_s14  ;;  %s741_s14 = smov %s659_s28 }
  0xc7   : > { %s742_s15 = smov %s561_s17  ;;  %s743_s16 = smov %s565_s18 }
  0xc8   : > { %s744_s17 = smov %s747_s22  ;;  %15 = sbr.rel (!%p13_p0) target bundleno = 5 (0x5), region = 78 }
  0xca   : > { %s745_s18 = smov %s738_s24 }
  0xcd   :  { %309 = vsyncpa [#allocation4], 1 }
  0xce   :  { %311 = vsyncpa [#allocation4 + $0x1], 1 }

// kernel: multi_head_attention_forward.3
= control target key start
LH: loop header
LB: loop body
LE: loop exit
PB: predicated region body
PF: predicated region fallthrough
CT: control target
= control target key end

     0   :  { %s587_s12 = smov 0   ;;  %s589_s13 = smov 0   ;;  %s644_s0 = inlined_call_operand.vmem [shape: bf16[3,2,8,32], index: 0, kind: input, shape index: {}]   ;;  %s645_s1 = inlined_call_operand.vmem [shape: bf16[3,32,32], index: 1, kind: input, shape index: {}]   ;;  %s646_s2 = inlined_call_operand.vmem [shape: f32[3,1,32], index: 2, kind: input, shape index: {}]   ;;  %s647_s3 = inlined_call_operand.vmem [shape: bf16[3,2,4,8,8], index: 3, kind: output, shape index: {}]  }
   0x1   :  { %s591_s14 = smov 0   ;;  %s593_s15 = smov 0  }
   0x2   :  { %s595_s16 = smov 0  }
   0x3 LB: > { %s28_s17 = sadd.s32 1, %s554_s14  ;;  %s32_s18 = sadd.s32 1, %s558_s15  ;;  %s562_s16 = sphi %s595_s16, %s13_s16   ;;  %s558_s15 = sphi %s593_s15, %s651_s15   ;;  %s554_s14 = sphi %s591_s14, %s650_s14   ;;  %s550_s13 = sphi %s589_s13, %s649_s13   ;;  %s546_s12 = sphi %s587_s12, %s648_s12  }
   0x4   : > { %p30_p0 = scmp.ge.s32.totalorder %s28_s17, 2  ;;  %p455_p1 = scmp.ge.s32.totalorder %s562_s16, 1 }
   0x5   : > { %p188_p2 = scmp.lt.s32.totalorder %s562_s16, 7 }
   0x6   : > { %s653_s17 = smov (%p30_p0, %s28_s17), 0  ;;  %s655_s18 = smov (!%p30_p0, %s32_s18), %s558_s15 }
   0x7   : > { %p189_p3 = pnand %p455_p1, %p188_p2  ;;  %p34_p4 = scmp.ge.s32.totalorder %s655_s18, 3 }
   0x8   : > { %p233_p5 = scmp.lt.s32.totalorder (!%p189_p3), %s550_s13, 2  ;;  %p235_p6 = scmp.lt.s32.totalorder (!%p189_p3), %s546_s12, 1 }
   0x9   : > { %s657_s18 = smov (%p34_p4, %s655_s18), 0  ;;  %192 = sbr.rel (%p189_p3) target bundleno = 279 (0x117), region = 32 }
   0xe   : > { %s659_s13 = smov (!%p233_p5, %s550_s13), 2  ;;  %s661_s12 = smov (!%p235_p6, %s546_s12), 1  ;;  %vm286_vm0 = vcmask 261120   ;;  %vm304_vm1 = vcmask 60416  }
   0xf   : > { %s477_s19 = sshll.u32 %s659_s13, 4  ;;  %s456_s20 = sshll.u32 %s659_s13, 1 }
  0x10   : > { %s248_s23 = scalar_lea.vmem %s645_s1, %s477_s19  ;;  %s241_s24 = sadd.s32 %s456_s20, %s661_s12 }
  0x11   : > { %v479_v0 = vld [vmem:[%s248_s23 + $0x8] sm:$0xff]  ;;  %s457_s25 = sshll.u32 %s241_s24, 2  ;;  %s251_s28 = scalar_lea.vmem %s646_s2, %s659_s13  ;;  %v478_v1 = vld [vmem:[%s248_s23] sm:$0xff] }
  0x12   : > { %296 = vmatpush.bf16.msra.mxu0 %v479_v0  ;;  %s243_s4 = scalar_lea.vmem %s644_s0, %s457_s25  ;;  %s460_s5 = sshll.u32 %s661_s12, 2  ;;  %v523_v3 = vld [vmem:[%s251_s28] ss:$0 sm:$0xff] }
  0x13   : > { %v265_v2 = vld [vmem:[%s243_s4] sm:$0xf]  ;;  %s461_s6 = sshll.u32 %s659_s13, 3  ;;  %s564_s19 = smov 104  }
  0x14   : > { %s261_s7 = sadd.s32 %s461_s6, %s460_s5  ;;  %s565_s20 = smov 120  }
  0x15   : > { %s462_s8 = sshll.u32 %s261_s7, 2  ;;  %s566_s12 = smov 112  }
  0x16   : > { %297 = vmatpush.bf16.msra.mxu0 %v478_v1  ;;  %s263_s11 = scalar_lea.vmem %s647_s3, %s462_s8 }
  0x19   : > { %471 = vmatmul.msk.bf16.vlgmr.msra.gmra.mxu0 %vm286_vm0, %v265_v2 }
  0x96   : > { %v299_v4 = vpop.f32.mrf.mxu0 }
  0x97   : > { %v300_v5 = vadd.f32 %v523_v3, %v299_v4 }
  0x99   : > { %v303_v6 = vpack.c.bf16 %v300_v5, %v300_v5 }
  0x9b   : > { %317 = vrot.lane.b32.xlu1 %v303_v6, %s564_s19  ;;  %307 = vrot.lane.b32.xlu0 %v303_v6, %s565_s20  ;;  %305 = vst.msk [vmem:[%s263_s11] sm:$0xf] %vm304_vm1, %v303_v6 }
  0x9e   : > { %v301_v7 = vpop.f32.mrf.mxu0 }
  0xa3   : > { %312 = vrot.lane.b32.xlu0 %v303_v6, %s566_s12 }
 0x10d   : > { %v318_v8 = vpop.permute.xlu1 %317  ;;  %v308_v9 = vpop.permute.xlu0 %307 }
 0x10e   : > { %474 = vst.msk [vmem:[%s263_s11 + $0xc] sm:$0xf] %vm304_vm1, %v318_v8 }
 0x10f   : > { %472 = vst.msk [vmem:[%s263_s11 + $0x4] sm:$0xf] %vm304_vm1, %v308_v9 }
 0x115   : > { %v313_v10 = vpop.permute.xlu0 %312 }
 0x116   : > { %473 = vst.msk [vmem:[%s263_s11 + $0x8] sm:$0xf] %vm304_vm1, %v313_v10 }
 0x117 PF: > { %s13_s16 = sadd.s32 1, %s562_s16   ;;  %s648_s12 = smov %s554_s14 }
 0x118   : > { %p10_p7 = scmp.ge.s32.totalorder %s13_s16, 8   ;;  %s649_s13 = smov %s558_s15 }
 0x119   : > { %s650_s14 = smov %s653_s17  ;;  %s651_s15 = smov %s657_s18 }
 0x11a   :  { %12 = sbr.rel (!%p10_p7) target bundleno = 3 (0x3), region = 71 }

</bundles_post_ra>
